<compile_context>
chip_gen: v6e
topology: v6e:2x2x1
jax: 0.10.0
libtpu: 0.0.40
codegen_flags: <defaults>
</compile_context>

<pallas_src>
import math

import jax
import jax.numpy as jnp
from jax.experimental import pallas as pl
from jax.experimental.pallas import tpu as pltpu


def _round_up(x, m):
    return ((x + m - 1) // m) * m


# ----------------------------- Pallas kernel ------------------------------- #
def _make_kde_kernel(n_rem: int):
    """Build the kernel; `n_rem` (static) = valid rows in the ragged last tile
    (0 means every tile is full and no masking code is emitted)."""

    def kernel(params_ref, w_ref, f2_ref, x_ref, out_ref, sx_ref, sxx_ref):
        # params_ref : SMEM (2,)        [log_norm, 1/N_real]
        # w_ref      : VMEM (D, Bp)     -2 * fw^T              (resident)
        # f2_ref     : VMEM (1, Bp)     ||f_i||^2              (resident)
        # x_ref      : VMEM (tn, D)     dataset tile           (streamed)
        # out_ref    : VMEM (1, Bp)     final estimates        (resident)
        # sx_ref     : VMEM (1, D)      running sum_j x_j
        # sxx_ref    : VMEM (1, D)      running per-column sum of x^2
        k = pl.program_id(0)
        nk = pl.num_programs(0)

        @pl.when(k == 0)
        def _init():
            sx_ref[...] = jnp.zeros_like(sx_ref)
            sxx_ref[...] = jnp.zeros_like(sxx_ref)

        def accumulate(xv):
            sx_ref[...] += jnp.sum(xv, axis=0, keepdims=True)        # [1, D]
            sxx_ref[...] += jnp.sum(xv * xv, axis=0, keepdims=True)  # [1, D]

        if n_rem == 0:
            accumulate(x_ref[...])
        else:
            # Full tiles: no masking cost.
            @pl.when(k < nk - 1)
            def _full():
                accumulate(x_ref[...])

            # Ragged last tile: zero out rows past the true dataset length
            # (the un-DMA'd tail of the VMEM buffer is stale/undefined).
            @pl.when(k == nk - 1)
            def _tail():
                tn = x_ref.shape[0]
                row = jax.lax.broadcasted_iota(jnp.int32, (tn, 1), 0)
                accumulate(jnp.where(row < n_rem, x_ref[...], 0.0))

        @pl.when(k == nk - 1)
        def _finalize():
            log_norm = params_ref[0]
            inv_n = params_ref[1]
            # [1, D] x [D, Bp] -> [1, Bp] : sum_d (sum_j x_jd) * (-2 f_id)
            contrib = jax.lax.dot_general(
                sx_ref[...], w_ref[...],
                dimension_numbers=(((1,), (0,)), ((), ())),
                preferred_element_type=jnp.float32)
            sum_x2 = jnp.sum(sxx_ref[...])                      # scalar
            # mean_j d2_ij = (sum||x||^2 - 2 f.sum_x)/N + ||f||^2 ; clamp for
            # safety against cancellation in the expanded form.
            mean_d2 = jnp.maximum((contrib + sum_x2) * inv_n + f2_ref[...], 0.0)
            out_ref[...] = log_norm - 0.5 * mean_d2

    return kernel


# ------------------------------ wrapper ------------------------------------ #
def kde_forward(features, bw_transform, dataset, log_norm, *, tn=4096):
    """Pallas forward of GaussianKDE. Returns estimates of shape [B] (f32)."""
    features = jnp.asarray(features, jnp.float32)
    bw_transform = jnp.asarray(bw_transform, jnp.float32)
    dataset = jnp.asarray(dataset, jnp.float32)

    B, D = features.shape
    N, d2_ = dataset.shape
    assert d2_ == D

    # Tiny hoisted work (O(B*D^2)): whitening matmul + feature norms.
    fw = features @ bw_transform                     # [B, D]
    f2 = jnp.sum(fw * fw, axis=1)                    # [B]

    b_pad = _round_up(B, 128)                        # lane-dense feature axis
    w_t = jnp.zeros((D, b_pad), jnp.float32).at[:, :B].set(-2.0 * fw.T)
    f2_p = jnp.zeros((1, b_pad), jnp.float32).at[0, :B].set(f2)

    # Dataset tiling: stream the dataset exactly once, unpadded (no HBM copy).
    if N <= tn:
        tn_eff, nk, n_rem = N, 1, 0                  # single full-extent block
    else:
        tn_eff = max(8, (tn // 8) * 8)               # sublane-legal tile rows
        nk = (N + tn_eff - 1) // tn_eff
        n_rem = N % tn_eff                           # ragged tail (0 = none)

    params = jnp.stack([
        jnp.asarray(log_norm, jnp.float32).reshape(()),
        jnp.asarray(1.0 / N, jnp.float32),
    ])

    out = pl.pallas_call(
        _make_kde_kernel(n_rem),
        out_shape=jax.ShapeDtypeStruct((1, b_pad), jnp.float32),
        grid_spec=pltpu.PrefetchScalarGridSpec(
            num_scalar_prefetch=0,
            grid=(nk,),
            in_specs=[
                pl.BlockSpec(memory_space=pltpu.MemorySpace.SMEM),  # params
                pl.BlockSpec((D, b_pad), lambda k: (0, 0)),         # -2 fw^T
                pl.BlockSpec((1, b_pad), lambda k: (0, 0)),         # ||f||^2
                pl.BlockSpec((tn_eff, D), lambda k: (k, 0)),        # dataset
            ],
            out_specs=pl.BlockSpec((1, b_pad), lambda k: (0, 0)),
            scratch_shapes=[pltpu.VMEM((1, D), jnp.float32),        # sum x
                            pltpu.VMEM((1, D), jnp.float32)],       # sum x^2
        ),
        compiler_params=pltpu.CompilerParams(
            dimension_semantics=("arbitrary",),
            vmem_limit_bytes=32 * 1024 * 1024),
        cost_estimate=pl.CostEstimate(
            flops=4 * N * D + 2 * D * b_pad,
            transcendentals=0,
            bytes_accessed=4 * (N * D + D * b_pad + 3 * b_pad + 2)),
    )(params, w_t, f2_p, dataset)
    return out[0, :B]


# --------------------------- fit (plain-JAX glue) --------------------------- #
# TODO(synk): covariance / matrix inverse / Cholesky have no clean Pallas
# equivalent; they run once at fit time in plain JAX (not on the hot path).
def _cov_unbiased(t):
    """Unbiased covariance of t (shape [D, N]) over dim=1 (GaussianKDE.cov)."""
    mean = jnp.mean(t, axis=1, keepdims=True)
    return (t - mean) @ (t - mean).T / (t.shape[1] - 1)


def kde_fit(dataset_raw):
    """Replicates GaussianKDE.fit: (bw_transform, dataset_whitened, log_norm)."""
    num_samples, dimension = dataset_raw.shape
    factor = num_samples ** (-1.0 / (dimension + 4))
    cov_mat = _cov_unbiased(dataset_raw.T)
    inv_cov = jnp.linalg.inv(cov_mat) / (factor ** 2)
    bw_transform = jnp.linalg.cholesky(inv_cov)           # lower triangular
    dataset = dataset_raw @ bw_transform
    norm = jnp.prod(jnp.diag(bw_transform))
    norm = norm * math.pow(2.0 * math.pi, -dimension / 2.0)
    log_norm = jnp.log(norm)
    return bw_transform, dataset, log_norm


# ------------------------------ reference ---------------------------------- #
def kde_forward_ref(features, bw_transform, dataset, log_norm):
    f = features @ bw_transform                         # [B, D]
    diff = dataset[None, :, :] - f[:, None, :]          # [B, N, D]
    d2 = jnp.sum(diff * diff, axis=2)                   # [B, N]
    emb = log_norm - d2 / 2.0
    return jnp.mean(emb, axis=1)                        # [B]


# --------------------------------- main ------------------------------------ #
if __name__ == "__main__":
    key = jax.random.PRNGKey(0)

    def run_case(n, d, b, k, tn=4096):
        k_data, k_feat = jax.random.split(k)
        dataset_raw = jax.random.normal(k_data, (n, d), dtype=jnp.float32)
        features = jax.random.normal(k_feat, (b, d), dtype=jnp.float32)

        bw_transform, dataset_w, log_norm = kde_fit(dataset_raw)

        est = kde_forward(features, bw_transform, dataset_w, log_norm, tn=tn)
        est = jax.block_until_ready(est)

        ref = kde_forward_ref(features, bw_transform, dataset_w, log_norm)
        assert est.shape == (b,)
        assert jnp.allclose(est, ref, rtol=2e-4, atol=1e-3), (est, ref)

    k1, k2, k3 = jax.random.split(key, 3)
    run_case(64, 16, 8, k1)                  # single tile, tiny shapes
    run_case(700, 24, 200, k2)               # single full-extent tile (N < tn)
    run_case(700, 24, 200, k3, tn=256)       # multi-tile + ragged-tail masking

    print("KERNEL_OK")
</pallas_src>

<mosaic_0001>
module attributes {stable_mosaic.version = 11 : i64} {
  func.func @kernel(%arg0: i32, %arg1: memref<2xf32, #tpu.memory_space<smem>>, %arg2: memref<16x128xf32, #tpu.memory_space<vmem>>, %arg3: memref<1x128xf32, #tpu.memory_space<vmem>>, %arg4: memref<64x16xf32, #tpu.memory_space<vmem>>, %arg5: memref<1x128xf32, #tpu.memory_space<vmem>>, %arg6: memref<1x16xf32, #tpu.memory_space<vmem>>, %arg7: memref<1x16xf32, #tpu.memory_space<vmem>>) attributes {dimension_semantics = [#tpu.dimension_semantics<arbitrary>], iteration_bounds = array<i64: 1>, scalar_prefetch = 0 : i64, scratch_operands = 2 : i64, tpu.core_type = #tpu.core_type<tc>, window_params = [{transform_indices = @transform_0, window_bounds = array<i64: 2>}, {pipeline_mode = #tpu.pipeline_mode<synchronous>, transform_indices = @transform_1, window_bounds = array<i64: 16, 128>}, {pipeline_mode = #tpu.pipeline_mode<synchronous>, transform_indices = @transform_2, window_bounds = array<i64: 1, 128>}, {transform_indices = @transform_3, window_bounds = array<i64: 64, 16>}, {pipeline_mode = #tpu.pipeline_mode<synchronous>, transform_indices = @transform_4, window_bounds = array<i64: 1, 128>}]} {
    %c0_i32 = arith.constant 0 : i32
    %0 = arith.cmpi eq, %arg0, %c0_i32 : i32
    %1 = arith.extui %0 : i1 to i32
    %c0_i32_0 = arith.constant 0 : i32
    %2 = arith.cmpi ne, %1, %c0_i32_0 : i32
    scf.if %2 {
      %cst_13 = arith.constant 0.000000e+00 : f32
      %18 = vector.broadcast %cst_13 : f32 to vector<1x16xf32>
      %c0_14 = arith.constant 0 : index
      %c0_15 = arith.constant 0 : index
      %19 = vector.load %arg6[%c0_14, %c0_15] : memref<1x16xf32, #tpu.memory_space<vmem>>, vector<1x16xf32>
      tpu.vector_store %arg6[%c0_14, %c0_15], %18 {strides = array<i32>} : memref<1x16xf32, #tpu.memory_space<vmem>>, vector<1x16xf32>,
      %cst_16 = arith.constant 0.000000e+00 : f32
      %20 = vector.broadcast %cst_16 : f32 to vector<1x16xf32>
      %c0_17 = arith.constant 0 : index
      %c0_18 = arith.constant 0 : index
      %21 = vector.load %arg7[%c0_17, %c0_18] : memref<1x16xf32, #tpu.memory_space<vmem>>, vector<1x16xf32>
      tpu.vector_store %arg7[%c0_17, %c0_18], %20 {strides = array<i32>} : memref<1x16xf32, #tpu.memory_space<vmem>>, vector<1x16xf32>,
    } else {
    }
    %c0 = arith.constant 0 : index
    %c0_1 = arith.constant 0 : index
    %3 = vector.load %arg4[%c0, %c0_1] : memref<64x16xf32, #tpu.memory_space<vmem>>, vector<64x16xf32>
    %c0_2 = arith.constant 0 : index
    %c0_3 = arith.constant 0 : index
    %4 = vector.load %arg6[%c0_2, %c0_3] : memref<1x16xf32, #tpu.memory_space<vmem>>, vector<1x16xf32>
    %cst = arith.constant dense<0.000000e+00> : vector<16xf32>
    %5 = vector.multi_reduction <add>, %3, %cst [0] : vector<64x16xf32> to vector<16xf32>
    %6 = vector.shape_cast %5 : vector<16xf32> to vector<1x16xf32>
    %7 = arith.addf %4, %6 : vector<1x16xf32>
    %c0_4 = arith.constant 0 : index
    %c0_5 = arith.constant 0 : index
    %8 = vector.load %arg6[%c0_4, %c0_5] : memref<1x16xf32, #tpu.memory_space<vmem>>, vector<1x16xf32>
    tpu.vector_store %arg6[%c0_4, %c0_5], %7 {strides = array<i32>} : memref<1x16xf32, #tpu.memory_space<vmem>>, vector<1x16xf32>,
    %c0_6 = arith.constant 0 : index
    %c0_7 = arith.constant 0 : index
    %9 = vector.load %arg7[%c0_6, %c0_7] : memref<1x16xf32, #tpu.memory_space<vmem>>, vector<1x16xf32>
    %10 = arith.mulf %3, %3 : vector<64x16xf32>
    %cst_8 = arith.constant dense<0.000000e+00> : vector<16xf32>
    %11 = vector.multi_reduction <add>, %10, %cst_8 [0] : vector<64x16xf32> to vector<16xf32>
    %12 = vector.shape_cast %11 : vector<16xf32> to vector<1x16xf32>
    %13 = arith.addf %9, %12 : vector<1x16xf32>
    %c0_9 = arith.constant 0 : index
    %c0_10 = arith.constant 0 : index
    %14 = vector.load %arg7[%c0_9, %c0_10] : memref<1x16xf32, #tpu.memory_space<vmem>>, vector<1x16xf32>
    tpu.vector_store %arg7[%c0_9, %c0_10], %13 {strides = array<i32>} : memref<1x16xf32, #tpu.memory_space<vmem>>, vector<1x16xf32>,
    %c0_i32_11 = arith.constant 0 : i32
    %15 = arith.cmpi eq, %arg0, %c0_i32_11 : i32
    %16 = arith.extui %15 : i1 to i32
    %c0_i32_12 = arith.constant 0 : i32
    %17 = arith.cmpi ne, %16, %c0_i32_12 : i32
    scf.if %17 {
      %c0_13 = arith.constant 0 : index
      %18 = memref.load %arg1[%c0_13] : memref<2xf32, #tpu.memory_space<smem>>
      %c1 = arith.constant 1 : index
      %19 = memref.load %arg1[%c1] : memref<2xf32, #tpu.memory_space<smem>>
      %c0_14 = arith.constant 0 : index
      %c0_15 = arith.constant 0 : index
      %20 = vector.load %arg6[%c0_14, %c0_15] : memref<1x16xf32, #tpu.memory_space<vmem>>, vector<1x16xf32>
      %c0_16 = arith.constant 0 : index
      %c0_17 = arith.constant 0 : index
      %21 = vector.load %arg2[%c0_16, %c0_17] : memref<16x128xf32, #tpu.memory_space<vmem>>, vector<16x128xf32>
      %cst_18 = arith.constant dense<0.000000e+00> : vector<1x128xf32>
      %22 = tpu.matmul %20, %21, %cst_18 {dimension_numbers = #tpu.dot_dimension_numbers<[1], [0], [0], [1], [0, 0, 1, 1], [], []>} : vector<1x16xf32>, vector<16x128xf32>, vector<1x128xf32> -> vector<1x128xf32>
      %c0_19 = arith.constant 0 : index
      %c0_20 = arith.constant 0 : index
      %23 = vector.load %arg7[%c0_19, %c0_20] : memref<1x16xf32, #tpu.memory_space<vmem>>, vector<1x16xf32>
      %24 = vector.shape_cast %23 : vector<1x16xf32> to vector<1x1x16xf32>
      %cst_21 = arith.constant dense<0.000000e+00> : vector<1xf32>
      %25 = vector.multi_reduction <add>, %24, %cst_21 [1, 2] : vector<1x1x16xf32> to vector<1xf32>
      %26 = vector.shape_cast %25 : vector<1xf32> to vector<1x1x1xf32>
      %27 = vector.extract %26[0, 0, 0] : f32 from vector<1x1x1xf32>
      %28 = vector.broadcast %27 : f32 to vector<1x128xf32>
      %29 = arith.addf %22, %28 : vector<1x128xf32>
      %30 = vector.broadcast %19 : f32 to vector<1x128xf32>
      %31 = arith.mulf %29, %30 : vector<1x128xf32>
      %c0_22 = arith.constant 0 : index
      %c0_23 = arith.constant 0 : index
      %32 = vector.load %arg3[%c0_22, %c0_23] : memref<1x128xf32, #tpu.memory_space<vmem>>, vector<1x128xf32>
      %33 = arith.addf %31, %32 : vector<1x128xf32>
      %cst_24 = arith.constant 0.000000e+00 : f32
      %34 = vector.broadcast %cst_24 : f32 to vector<1x128xf32>
      %35 = arith.maximumf %33, %34 : vector<1x128xf32>
      %cst_25 = arith.constant 5.000000e-01 : f32
      %36 = vector.broadcast %cst_25 : f32 to vector<1x128xf32>
      %37 = arith.mulf %36, %35 : vector<1x128xf32>
      %38 = vector.broadcast %18 : f32 to vector<1x128xf32>
      %39 = arith.subf %38, %37 : vector<1x128xf32>
      %c0_26 = arith.constant 0 : index
      %c0_27 = arith.constant 0 : index
      %40 = vector.load %arg5[%c0_26, %c0_27] : memref<1x128xf32, #tpu.memory_space<vmem>>, vector<1x128xf32>
      tpu.vector_store %arg5[%c0_26, %c0_27], %39 {strides = array<i32>} : memref<1x128xf32, #tpu.memory_space<vmem>>, vector<1x128xf32>,
    } else {
    }
    return
  }
  func.func @transform_0(%arg0: i32) -> i32 {
    %c0_i32 = arith.constant 0 : i32
    %c0_i32_0 = arith.constant 0 : i32
    return %c0_i32 : i32
  }
  func.func @transform_1(%arg0: i32) -> (i32, i32) {
    %c0_i32 = arith.constant 0 : i32
    %c0_i32_0 = arith.constant 0 : i32
    %c0_i32_1 = arith.constant 0 : i32
    return %c0_i32, %c0_i32_0 : i32, i32
  }
  func.func @transform_2(%arg0: i32) -> (i32, i32) {
    %c0_i32 = arith.constant 0 : i32
    %c0_i32_0 = arith.constant 0 : i32
    %c0_i32_1 = arith.constant 0 : i32
    return %c0_i32, %c0_i32_0 : i32, i32
  }
  func.func @transform_3(%arg0: i32) -> (i32, i32) {
    %c0_i32 = arith.constant 0 : i32
    %c0_i32_0 = arith.constant 0 : i32
    return %arg0, %c0_i32 : i32, i32
  }
  func.func @transform_4(%arg0: i32) -> (i32, i32) {
    %c0_i32 = arith.constant 0 : i32
    %c0_i32_0 = arith.constant 0 : i32
    %c0_i32_1 = arith.constant 0 : i32
    return %c0_i32, %c0_i32_0 : i32, i32
  }
}

</mosaic_0001>

<bundles_post_ra>
// kernel: tpu_custom_call.1
= control target key start
LH: loop header
LB: loop body
LE: loop exit
PB: predicated region body
PF: predicated region fallthrough
CT: control target
= control target key end

     0   :  { %9 = vsyncpa [#allocation6], 0  ;;  %s365_s0 = inlined_call_operand.vmem [shape: f32[2], index: 0, kind: input, shape index: {}]   ;;  %s366_s1 = inlined_call_operand.vmem [shape: f32[16,128], index: 1, kind: input, shape index: {}]   ;;  %s367_s2 = inlined_call_operand.vmem [shape: f32[1,128], index: 2, kind: input, shape index: {}]   ;;  %s368_s3 = inlined_call_operand.vmem [shape: f32[64,16], index: 3, kind: input, shape index: {}]   ;;  %s369_s4 = inlined_call_operand.hbm [shape: f32[1,128], index: 4, kind: output, shape index: {}]  }
   0x1   :  { %10 = vsyncpa [#allocation5], 0  ;;  %s17_s17 = sshll.u32 %s365_s0, 4  ;;  %s18_s17 = int_to_ptr.vmem [resolvable:$true] %s17_s17 }
   0x2   :  { %s239_s18 = scalar_lea.vmem %s18_s17, 16  ;;  %p244_p1 = scmp.lt.s32.totalorder %s18_s17, %s18_s17 }
   0x3   :  { %p240_p0 = scmp.ne.s32.totalorder %s18_s17, %s239_s18  ;;  %p245_p2 = scmp.lt.s32.totalorder %s239_s18, %s239_s18 }
   0x5   :  { %p246_p3 = por %p245_p2, %p244_p1 }
   0x7   :  { %p247_p4 = pnand %p246_p3, %p240_p0 }
   0x9   :  { %250 = shalt.err (!%p247_p4)
}
   0xa   :  { %s275_s19 = smov [#allocation4]  }
   0xb   :  { %20 = dma.vmem_to_smem %s18_s17, 16, %s275_s19, [#allocation6]  }
   0xc   :  { %271 = dma.done.wait [#allocation6], 16  }
   0xd   :  { %272 = vsyncadd [#allocation6], 4294967280 }
   0xe   :  { %30 = sfence }
   0xf   :  { %vm35_vm0 = vcmask 122880   ;;  %v38_v0 = vld [vmem:[%s368_s3] sm:$0xff]  ;;  %v39_v1 = vld [vmem:[%s368_s3 + $0x8] sm:$0xff]  ;;  %v40_v2 = vld [vmem:[%s368_s3 + $0x10] sm:$0xff]  ;;  %vm47_vm1 = vcmask 130048   ;;  %v276_v3 = vmov 0.0  }
  0x10   :  { %36 = vst.msk [vmem:[#allocation2] sm:$0x1] %vm35_vm0, %v276_v3  ;;  %37 = vst.msk [vmem:[#allocation3] sm:$0x1] %vm35_vm0, %v276_v3  ;;  %v41_v4 = vld [vmem:[%s368_s3 + $0x18] sm:$0xff]  ;;  %v48_v5 = vsel %vm47_vm1, %v38_v0, 0.0  ;;  %v73_v8 = vmul.f32 %v38_v0, %v38_v0  ;;  %226 = vmatprep.subr.mxu0 %v276_v3  ;;  %v74_v13 = vmul.f32 %v39_v1, %v39_v1 }
  0x11   :  { %v49_v6 = vsel %vm47_vm1, %v39_v1, 0.0  ;;  %v51_v7 = vsel %vm47_vm1, %v40_v2, 0.0  ;;  %v42_v9 = vld [vmem:[%s368_s3 + $0x20] sm:$0xff]  ;;  %v111_v11 = vld [vmem:[%s366_s1 + $0x8] sm:$0xff]  ;;  %v53_v12 = vsel %vm47_vm1, %v41_v4, 0.0  ;;  %v75_v14 = vmul.f32 %v40_v2, %v40_v2  ;;  %v44_v23 = vld [vmem:[%s368_s3 + $0x30] sm:$0xff] }
  0x12   :  { %v50_v10 = vadd.f32 %v49_v6, %v48_v5  ;;  %227 = vmatpush3.msra.mxu0 %v111_v11  ;;  %v110_v15 = vld [vmem:[%s366_s1] sm:$0xff]  ;;  %v43_v16 = vld [vmem:[%s368_s3 + $0x28] sm:$0xff]  ;;  %v76_v18 = vmul.f32 %v41_v4, %v41_v4  ;;  %v55_v19 = vsel %vm47_vm1, %v42_v9, 0.0  ;;  %v77_v20 = vmul.f32 %v42_v9, %v42_v9  ;;  %v45_v30 = vld [vmem:[%s368_s3 + $0x38] sm:$0xff]  ;;  %s221_s3 = sld [smem:[#allocation4 + $0x1]]  ;;  %s278_s16 = smov [#allocation7]  }
  0x13   :  { %228 = vmatprep.subr.mxu0 %v276_v3  ;;  %v81_v21 = vsel %vm47_vm1, %v73_v8, 0.0  ;;  %v82_v22 = vsel %vm47_vm1, %v74_v13, 0.0  ;;  %v84_v26 = vsel %vm47_vm1, %v75_v14, 0.0  ;;  %v57_v27 = vsel %vm47_vm1, %v43_v16, 0.0  ;;  %s107_s13 = sld [smem:[#allocation4]]  ;;  %s212_s17 = sshll.u32 %s278_s16, 4  ;;  %s213_s17 = int_to_ptr.vmem [resolvable:$true] %s212_s17 }
  0x14   :  { %v52_v17 = vadd.f32 %v51_v7, %v50_v10  ;;  %229 = vmatpush3.msra.mxu0 %v110_v15  ;;  %v83_v25 = vadd.f32 %v82_v22, %v81_v21  ;;  %v78_v28 = vmul.f32 %v43_v16, %v43_v16  ;;  %v86_v29 = vsel %vm47_vm1, %v76_v18, 0.0  ;;  %v199_v16 = vld [vmem:[%s367_s2] sm:$0x1]  ;;  %s251_s18 = scalar_lea.vmem %s213_s17, 16  ;;  %s255_s19 = scalar_lea.vmem %s213_s17, 32 }
  0x15   :  { %v59_v33 = vsel %vm47_vm1, %v44_v23, 0.0  ;;  %v79_v34 = vmul.f32 %v44_v23, %v44_v23  ;;  %v88_v35 = vsel %vm47_vm1, %v77_v20, 0.0  ;;  %vm277_vm2 = vmmov 0   ;;  %p252_p5 = scmp.ne.s32.totalorder %s213_s17, %s251_s18  ;;  %p256_p6 = scmp.lt.s32.totalorder %s213_s17, %s213_s17 }
  0x16   :  { %v54_v24 = vadd.f32 %v53_v12, %v52_v17  ;;  %v85_v32 = vadd.f32 %v84_v26, %v83_v25  ;;  %230 = vmatprep.mubr.msk.f32.mxu0 %vm277_vm2, %v276_v3  ;;  %v61_v38 = vsel %vm47_vm1, %v45_v30, 0.0  ;;  %v80_v39 = vmul.f32 %v45_v30, %v45_v30  ;;  %p257_p7 = scmp.lt.s32.totalorder %s255_s19, %s251_s18 }
  0x17   :  { %v90_v40 = vsel %vm47_vm1, %v78_v28, 0.0  ;;  %v92_v43 = vsel %vm47_vm1, %v79_v34, 0.0  ;;  %v46_v57 = vld [vmem:[#allocation2] sm:$0x1]  ;;  %v72_v62 = vld [vmem:[#allocation3] sm:$0x1] }
  0x18   :  { %v56_v31 = vadd.f32 %v55_v19, %v54_v24  ;;  %v87_v37 = vadd.f32 %v86_v29, %v85_v32  ;;  %v94_v46 = vsel %vm47_vm1, %v80_v39, 0.0  ;;  %v197_v14 = vstv %s221_s3  ;;  %p258_p8 = por %p257_p7, %p256_p6 }
  0x19   :  { %v203_v20 = vstv %s107_s13 }
  0x1a   :  { %v58_v36 = vadd.f32 %v57_v27, %v56_v31  ;;  %v89_v42 = vadd.f32 %v88_v35, %v87_v37  ;;  %p259_p9 = pnand %p258_p8, %p252_p5 }
  0x1c   :  { %v60_v41 = vadd.f32 %v59_v33, %v58_v36  ;;  %v91_v45 = vadd.f32 %v90_v40, %v89_v42 }
  0x1e   :  { %v62_v44 = vadd.f32 %v61_v38, %v60_v41  ;;  %v93_v48 = vadd.f32 %v92_v43, %v91_v45 }
  0x20   :  { %v63_v47 = vrot.slane %v62_v44, 4  ;;  %v95_v50 = vadd.f32 %v94_v46, %v93_v48 }
  0x22   :  { %v64_v49 = vadd.f32 %v63_v47, %v62_v44  ;;  %v96_v52 = vrot.slane %v95_v50, 4 }
  0x24   :  { %v65_v51 = vrot.slane %v64_v49, 2  ;;  %v97_v54 = vadd.f32 %v96_v52, %v95_v50 }
  0x26   :  { %v66_v53 = vadd.f32 %v65_v51, %v64_v49  ;;  %v98_v56 = vrot.slane %v97_v54, 2 }
  0x28   :  { %v67_v55 = vrot.slane %v66_v53, 1  ;;  %v99_v59 = vadd.f32 %v98_v56, %v97_v54 }
  0x2a   :  { %v68_v58 = vadd.f32 %v67_v55, %v66_v53  ;;  %v100_v61 = vrot.slane %v99_v59, 1 }
  0x2c   :  { %v69_v60 = vadd.f32 %v68_v58, %v46_v57  ;;  %v101_v63 = vadd.f32 %v100_v61, %v99_v59 }
  0x2e   :  { %71 = vst.msk [vmem:[#allocation2] sm:$0x1] %vm35_vm0, %v69_v60  ;;  %v102_v0 = vadd.f32 %v101_v63, %v72_v62 }
  0x30   :  { %103 = vst.msk [vmem:[#allocation3] sm:$0x1] %vm35_vm0, %v102_v0 }
  0x35   :  { %v109_v1 = vld [vmem:[#allocation2] sm:$0x1] }
  0x36   :  { %231 = vmatmul.mubr.msk.f32.vlgmr.msra.gmra.mxu0 %vm47_vm1, %v109_v1 }
  0x37   :  { %v112_v2 = vld [vmem:[#allocation3] sm:$0x1] }
  0x38   :  { %v113_v3 = vsel %vm35_vm0, %v112_v2, 0.0 }
  0x39   :  { %114 = vadd.xlane.f32.xlu0 %v113_v3 }
  0xc2   :  { %v115_v4 = vpop.xlane.xlu0 %114 }
  0xc3   :  { %v116_v5 = vrot.slane %v115_v4, 4 }
  0xc5   :  { %v117_v6 = vadd.f32 %v116_v5, %v115_v4 }
  0xc7   :  { %v118_v7 = vrot.slane %v117_v6, 2 }
  0xc9   :  { %v119_v8 = vadd.f32 %v118_v7, %v117_v6 }
  0xcb   :  { %v120_v9 = vrot.slane %v119_v8, 1 }
  0xcd   :  { %v121_v10 = vadd.f32 %v120_v9, %v119_v8 }
  0xcf   :  { %233 = vpush %v121_v10 }
  0xf6   :  { %v193_v11 = vpop.f32.mrf.mxu0 }
  0xf8   :  { %v232_v12 = vpop.f32.mrf.mxu0 }
 0x100   :  { %s234_s12 = spop %233 }
 0x101   :  { %v123_v13 = vstv %s234_s12 }
 0x102   :  { %v194_v15 = vadd.f32 %v193_v11, %v123_v13 }
 0x104   :  { %v198_v17 = vmul.f32 %v197_v14, %v194_v15 }
 0x106   :  { %v200_v18 = vadd.f32 %v199_v16, %v198_v17 }
 0x108   :  { %v201_v19 = vmax.f32 %v200_v18, 0.0 }
 0x10a   :  { %v202_v21 = vmul.f32 0.5, %v201_v19 }
 0x10c   :  { %v204_v22 = vsub.f32 %v203_v20, %v202_v21 }
 0x10e   :  { %205 = vst [vmem:[#allocation7] sm:$0x1] %v204_v22 }
 0x10f   :  { %262 = shalt.err (!%p259_p9)
}
 0x110   :  { %215 = dma.vmem_to_hbm [thread:$0]  %s213_s17, 16, %s369_s4, [#allocation5]  }
 0x111   :  { %273 = dma.done.wait [#allocation5], 16  }
 0x112   :  { %274 = vsyncadd [#allocation5], 4294967280 }
 0x113   :  { %219 = vsyncpa [#allocation5], 1 }
 0x114   :  { %220 = vsyncpa [#allocation6], 1 }

</bundles_post_ra>
